<compile_context>
chip_gen: v7x
topology: tpu7x:2x2x1
jax: 0.10.0
libtpu: 0.0.40
codegen_flags: <defaults>
</compile_context>

<pallas_src>
import functools

import numpy as np
import jax
import jax.numpy as jnp
from jax import lax
from jax.experimental import pallas as pl
from jax.experimental.pallas import tpu as pltpu


# ----------------------------------------------------------------------------
# Skeleton topology bookkeeping (pure Python __init__-time glue, mirrors the
# PyTorch Encoder / SkeletonPool / find_neighbor logic the Decoder depends on).
# ----------------------------------------------------------------------------
def calc_edge_mat(edges):
    n = len(edges)
    INF = 100000
    mat = [[INF] * n for _ in range(n)]
    for i in range(n):
        mat[i][i] = 0
    for i, a in enumerate(edges):
        for j, b in enumerate(edges):
            if a[0] in (b[0], b[1]) or a[1] in (b[0], b[1]):
                mat[i][j] = min(mat[i][j], 1)
    for k in range(n):
        for i in range(n):
            for j in range(n):
                mat[i][j] = min(mat[i][j], mat[i][k] + mat[k][j])
    return mat


def find_neighbor(edges, d):
    mat = calc_edge_mat(edges)
    n = len(mat)
    neighbor_list = [[j for j in range(n) if mat[i][j] <= d] for i in range(n)]
    global_part_neighbor = neighbor_list[0].copy()
    # reproduces the (intentional) asymmetry of the original implementation
    for i in global_part_neighbor:
        neighbor_list[i].append(n)
    neighbor_list.append(global_part_neighbor)
    return neighbor_list


def skeleton_pool(edges, last_pool):
    """Returns (pooling_list, new_edges) exactly like SkeletonPool.__init__."""
    edge_num = len(edges) + 1
    seq_list, pooling_list, new_edges = [], [], []
    degree = [0] * 256
    for e in edges:
        degree[e[0]] += 1
        degree[e[1]] += 1

    def find_seq(j, seq):
        if degree[j] > 2 and j != 0:
            seq_list.append(seq)
            seq = []
        if degree[j] == 1:
            seq_list.append(seq)
            return
        for idx, e in enumerate(edges):
            if e[0] == j:
                find_seq(e[1], seq + [idx])

    find_seq(0, [])
    for seq in seq_list:
        if last_pool:
            pooling_list.append(seq)
            continue
        if len(seq) % 2 == 1:
            pooling_list.append([seq[0]])
            new_edges.append(edges[seq[0]])
            seq = seq[1:]
        for i in range(0, len(seq), 2):
            pooling_list.append([seq[i], seq[i + 1]])
            new_edges.append([edges[seq[i]][0], edges[seq[i + 1]][1]])
    pooling_list.append([edge_num - 1])        # global "edge"
    return pooling_list, new_edges


def build_encoder_meta(topology, num_layers, skeleton_dist, typeofchannel=3):
    """Only the Encoder bookkeeping the Decoder actually reads."""
    topologies = [topology]
    channel_base = [typeofchannel]
    channel_list = []
    edge_num = [len(topology) + 1]
    pooling_lists = []
    for _ in range(num_layers):
        channel_base.append(channel_base[-1] * 2)
    for i in range(num_layers):
        neighbor_list = find_neighbor(topologies[i], skeleton_dist)
        in_channels = channel_base[i] * edge_num[i]
        out_channels = channel_base[i + 1] * edge_num[i]
        if i == 0:
            channel_list.append(in_channels)
        channel_list.append(out_channels)
        assert out_channels % len(neighbor_list) == 0
        last_pool = (i == num_layers - 1)
        pooling_list, new_edges = skeleton_pool(topologies[i], last_pool)
        topologies.append(new_edges)
        pooling_lists.append(pooling_list)
        edge_num.append(len(pooling_list))
    last_channel = len(pooling_lists[-1]) * channel_base[num_layers]
    return dict(topologies=topologies, channel_base=channel_base,
                channel_list=channel_list, edge_num=edge_num,
                pooling_lists=pooling_lists, last_channel=last_channel)


# ----------------------------------------------------------------------------
# Parameter construction (deterministic synthetic init; masks follow the
# SkeletonConv / SkeletonLinear / SkeletonUnpool connectivity rules exactly).
# ----------------------------------------------------------------------------
def unpool_weight(pooling_list, cpe):
    in_edges = len(pooling_list)
    out_edges = sum(len(t) for t in pooling_list)
    W = np.zeros((out_edges * cpe, in_edges * cpe), np.float32)
    for i, group in enumerate(pooling_list):
        for j in group:
            for c in range(cpe):
                W[j * cpe + c, i * cpe + c] = 1.0
    return jnp.asarray(W)


def skeleton_mask(neighbor_list, in_cpj, out_cpj, extra_shape=()):
    J = len(neighbor_list)
    mask = np.zeros((J * out_cpj, J * in_cpj) + extra_shape, np.float32)
    for i, nb in enumerate(neighbor_list):
        cols = [k * in_cpj + c for k in nb for c in range(in_cpj)]
        mask[i * out_cpj:(i + 1) * out_cpj, cols] = 1.0
    return mask


def build_decoder_params(meta, num_layers, skeleton_dist, kernel_size, key):
    layers = []
    cb = meta["channel_base"]
    for i in range(num_layers):
        in_channels = meta["channel_list"][num_layers - i]
        out_channels = in_channels // 2
        topo = meta["topologies"][num_layers - i - 1]
        neighbor_list = find_neighbor(topo, skeleton_dist)
        J = meta["edge_num"][num_layers - i - 1]
        assert J == len(neighbor_list)

        # SkeletonUnpool duplication matrix
        pooling_list = meta["pooling_lists"][num_layers - i - 1]
        cpe = in_channels // len(neighbor_list)
        Wu = unpool_weight(pooling_list, cpe)

        # masked SkeletonConv weight, torch layout (C_out, C_in, K)
        in_cpj = in_channels // J
        out_cpj = out_channels // J
        cmask = skeleton_mask(neighbor_list, in_cpj, out_cpj, extra_shape=(kernel_size,))
        key, k1, k2, k3, k4 = jax.random.split(key, 5)
        Wc = (jax.random.normal(k1, (out_channels, in_channels, kernel_size), jnp.float32)
              * 0.1) * jnp.asarray(cmask)
        bias = jax.random.normal(k2, (out_channels,), jnp.float32) * 0.1

        # masked offset_enc (SkeletonLinear) weight
        in_off = 3 * cb[num_layers - i - 1] // cb[0]
        lmask = skeleton_mask(neighbor_list, in_off, out_channels // J)
        Woff = (jax.random.normal(k3, (out_channels, in_off * J), jnp.float32)
                * 0.1) * jnp.asarray(lmask)
        boff = jax.random.normal(k4, (out_channels,), jnp.float32) * 0.1

        layers.append(dict(Wu=Wu, Wc=Wc, bias=bias, Woff=Woff, boff=boff,
                           apply_act=(i != num_layers - 1)))
    return layers


# ----------------------------------------------------------------------------
# Host-side (init-time) construction of the fused kernel operands.
# ----------------------------------------------------------------------------
def _round_up(x, m):
    return ((x + m - 1) // m) * m


def make_upsample_tap_cat(t_in, t_in_p, t_out, t_out_p, kernel_size, pad):
    """Ucat (t_in_p, K*t_out_p): (x @ Ucat)[:, k*t_out_p + t] == zeropad(upsample_x2(x))[:, t+k]
    i.e. every conv tap's view of the zero-padded, linearly upsampled signal, so the whole
    Upsample -> pad -> shift chain (for ALL K taps) is ONE aligned MXU matmul per layer.
    Rows >= t_in and per-tap columns >= t_out are zero, so lane/channel padding of the
    activation never contaminates the result."""
    t_up = 2 * t_in
    # nn.Upsample(scale_factor=2, mode='linear', align_corners=False) as a matrix
    U = np.zeros((t_in, t_up), np.float32)
    for d in range(t_up):
        src = max((d + 0.5) / 2.0 - 0.5, 0.0)
        i0 = min(int(np.floor(src)), t_in - 1)
        i1 = min(i0 + 1, t_in - 1)
        frac = src - i0
        U[i0, d] += 1.0 - frac
        U[i1, d] += frac
    Ucat = np.zeros((t_in_p, kernel_size * t_out_p), np.float32)
    for k in range(kernel_size):
        for t in range(t_out):
            s = t + k - pad            # source column in the unpadded upsampled signal
            if 0 <= s < t_up:
                Ucat[:t_in, k * t_out_p + t] = U[:, s]
    return Ucat


def build_fused_operands(layers, t_in, *, lane_align=128, compute_dtype=jnp.float32):
    """Per layer: Wbig (C_out_p, K*C_in_p) with SkeletonUnpool folded in, and Ucat
    (T_in_p, K*T_out_p) — the batch-SHARED upsample+pad+tap-shift operator. All shape-static
    work is hoisted here (init time)."""
    chan_align = 16 if np.dtype(compute_dtype) == np.dtype(jnp.bfloat16) else 8
    fused = []
    t = t_in
    t_p = _round_up(max(t, 1), lane_align)
    for p in layers:
        Wc = np.asarray(p["Wc"], np.float32)     # (C_out, C_unpool, K) torch conv layout
        Wu = np.asarray(p["Wu"], np.float32)     # (C_unpool, C_prev)   0/1 unpool matrix
        C_out, _, K = Wc.shape
        C_prev = Wu.shape[1]
        pad = (K - 1) // 2

        # fold SkeletonUnpool into the masked conv weight (exact: Wu is 0/1)
        A = np.einsum("ouk,up->kop", Wc, Wu)     # (K, C_out, C_prev)
        C_in_p = _round_up(C_prev, chan_align)   # sublane-aligned channel padding
        C_out_p = _round_up(C_out, chan_align)
        if fused:                                 # inter-layer channel/lane chain must agree
            assert fused[-1]["C_out_p"] == C_in_p and fused[-1]["t_out_p"] == t_p
        Wbig = np.zeros((C_out_p, K * C_in_p), np.float32)
        for k in range(K):
            Wbig[:C_out, k * C_in_p:k * C_in_p + C_prev] = A[k]

        t_out = 2 * t + 2 * pad - K + 1           # Conv1d stride-1 output length
        t_out_p = _round_up(t_out, lane_align)    # lane-dense (128) time padding
        Ucat = make_upsample_tap_cat(t, t_p, t_out, t_out_p, K, pad)

        fused.append(dict(
            Wbig=jnp.asarray(Wbig, dtype=compute_dtype),
            Ucat=jnp.asarray(Ucat, dtype=compute_dtype),
            C_in=C_prev, C_in_p=C_in_p, C_out=C_out, C_out_p=C_out_p,
            K=K, t_in=t, t_in_p=t_p, t_out=t_out, t_out_p=t_out_p,
            apply_act=p["apply_act"]))
        t, t_p = t_out, t_out_p
    return fused


# ----------------------------------------------------------------------------
# Pallas kernel: the whole decoder (all layers) for ONE batch element per grid
# step; the batch axis is a "parallel" grid axis (megacore sharding on v7x).
# ----------------------------------------------------------------------------
def _decoder_fused_kernel(*refs, layer_meta, neg_slope, compute_dtype):
    num_layers = len(layer_meta)
    x_ref = refs[0]
    layer_refs = refs[1:1 + 3 * num_layers]
    o_ref = refs[1 + 3 * num_layers]
    xbig = refs[2 + 3 * num_layers]               # ONE shared scratch, reused every layer

    x = x_ref[0]                                  # (C_in_p, T_in_p), compute dtype
    y = None
    for l, m in enumerate(layer_meta):
        u_ref, w_ref, b_ref = layer_refs[3 * l:3 * l + 3]
        K, cinp, tout_p = m["K"], m["C_in_p"], m["t_out_p"]

        # 1) Upsample(x2,'linear') + zero pad + all K conv-tap shifts in ONE MXU push:
        #    tap k's view lives at lanes [k*T_out_p, (k+1)*T_out_p).
        xwide = jnp.dot(x, u_ref[...], preferred_element_type=jnp.float32)
        xwide = xwide.astype(compute_dtype)

        # 2) restack taps onto the contraction dim (8-sublane / 128-lane aligned copies).
        for k in range(K):
            xbig[pl.ds(k * cinp, cinp), pl.ds(0, tout_p)] = (
                xwide[:, k * tout_p:(k + 1) * tout_p])

        # 3) SkeletonUnpool + masked SkeletonConv folded into one big-contraction matmul
        #    (f32 accumulation on the MXU).
        y = jnp.dot(w_ref[...], xbig[pl.ds(0, K * cinp), pl.ds(0, tout_p)],
                    preferred_element_type=jnp.float32)

        # 4) conv bias + offset_enc(offset)/100: per-batch (C_out_p, 1) column, broadcast
        #    over the time lanes in-kernel; optional LeakyReLU(0.2).
        y = y + b_ref[0]
        if m["apply_act"]:
            y = jnp.where(y >= 0.0, y, neg_slope * y)
        x = y.astype(compute_dtype)               # next layer's MXU operand (stays on-chip)

    o_ref[0] = y.astype(o_ref.dtype)


def decoder_forward_pallas(x, offsets, layers, fused, meta):
    B, C0, T0 = x.shape
    L = len(layers)
    f0, fL = fused[0], fused[-1]
    compute_dtype = fused[0]["Wbig"].dtype

    # ---- tiny host/XLA glue: offset_enc (masked SkeletonLinear) + conv bias folded into
    #      a per-batch (C_out_p, 1) column; the time broadcast happens in-kernel. ----
    bias_cols = []
    for i, (p, f) in enumerate(zip(layers, fused)):
        off = offsets[L - i - 1]                                   # set_offset(offset[n-i-1])
        off_res = off.reshape(B, -1) @ p["Woff"].T + p["boff"]     # (B, C_out)
        col = p["bias"][None, :] + off_res / 100.0                 # (B, C_out)
        colp = jnp.zeros((B, f["C_out_p"], 1), jnp.float32)
        colp = colp.at[:, :f["C_out"], 0].set(col)
        bias_cols.append(colp)

    # ---- pack the input as a channel-major, lane-dense (B, C0_p, T0_p) slab ----
    C0_p, T0_p = f0["C_in_p"], f0["t_in_p"]
    x_p = jnp.zeros((B, C0_p, T0_p), compute_dtype)
    x_p = x_p.at[:, :C0, :T0].set(x.astype(compute_dtype))

    inputs = [x_p]
    in_specs = [pl.BlockSpec((1, C0_p, T0_p), lambda b: (b, 0, 0))]
    for f, colp in zip(fused, bias_cols):
        inputs += [f["Ucat"], f["Wbig"], colp]
        in_specs += [
            pl.BlockSpec(f["Ucat"].shape, lambda b: (0, 0)),       # batch-invariant weight
            pl.BlockSpec(f["Wbig"].shape, lambda b: (0, 0)),       # batch-invariant weight
            pl.BlockSpec((1, f["C_out_p"], 1), lambda b: (b, 0, 0)),
        ]

    out_shape = jax.ShapeDtypeStruct((B, fL["C_out_p"], fL["t_out_p"]), jnp.float32)
    out_spec = pl.BlockSpec((1, fL["C_out_p"], fL["t_out_p"]), lambda b: (b, 0, 0))

    # ONE shared scratch (max footprint over layers), reused by every layer.
    sc_rows = max(f["K"] * f["C_in_p"] for f in fused)
    sc_cols = max(f["t_out_p"] for f in fused)
    scratch_shapes = [pltpu.VMEM((sc_rows, sc_cols), compute_dtype)]

    layer_meta = tuple(dict(K=f["K"], C_in_p=f["C_in_p"], t_out_p=f["t_out_p"],
                            apply_act=f["apply_act"]) for f in fused)
    kernel = functools.partial(_decoder_fused_kernel, layer_meta=layer_meta,
                               neg_slope=0.2, compute_dtype=compute_dtype)

    # advisory cost estimate + explicit VMEM budget (weights resident, act/bias/out per step)
    itemsize = np.dtype(compute_dtype).itemsize
    flops = 2 * B * sum(f["C_in_p"] * f["t_in_p"] * f["K"] * f["t_out_p"]
                        + f["C_out_p"] * f["K"] * f["C_in_p"] * f["t_out_p"] for f in fused)
    bytes_accessed = sum(int(np.prod(a.shape)) * a.dtype.itemsize for a in inputs)
    bytes_accessed += int(np.prod(out_shape.shape)) * 4
    blk_bytes = sum(2 * int(np.prod(a.shape[1:] if a.ndim == 3 else a.shape))
                    * a.dtype.itemsize for a in inputs)               # double-buffered blocks
    blk_bytes += 2 * fL["C_out_p"] * fL["t_out_p"] * 4 + sc_rows * sc_cols * itemsize
    vmem_limit = int(min(blk_bytes + (16 << 20), 120 << 20))

    out = pl.pallas_call(
        kernel,
        out_shape=out_shape,
        grid_spec=pltpu.PrefetchScalarGridSpec(
            num_scalar_prefetch=0,
            grid=(B,),                               # batch on a parallel grid axis
            in_specs=in_specs,
            out_specs=out_spec,
            scratch_shapes=scratch_shapes),
        compiler_params=pltpu.CompilerParams(
            dimension_semantics=("parallel",),
            vmem_limit_bytes=vmem_limit),
        cost_estimate=pl.CostEstimate(flops=flops, transcendentals=0,
                                      bytes_accessed=bytes_accessed),
    )(*inputs)

    # ---- drop channel/time padding -> (B, C_out, T_out) ----
    y = out[:, :fL["C_out"], :fL["t_out"]]
    if meta["channel_base"][0] == 4:               # not taken for typeofchannel=3
        y = y[:, :-1, :]
    return y


# ----------------------------------------------------------------------------
# Pure-JAX reference for validation.
# ----------------------------------------------------------------------------
def upsample_linear_x2_ref(x):
    T = x.shape[-1]
    dst = np.arange(2 * T)
    src = np.maximum((dst + 0.5) / 2.0 - 0.5, 0.0)
    i0 = np.minimum(np.floor(src).astype(np.int32), T - 1)
    i1 = np.minimum(i0 + 1, T - 1)
    frac = (src - i0).astype(np.float32)
    return x[..., i0] * (1.0 - frac) + x[..., i1] * frac


def reference_forward(x, offsets, layers, meta):
    n = len(layers)
    for i, p in enumerate(layers):
        off = offsets[n - i - 1]
        off_flat = off.reshape(off.shape[0], -1)
        off_res = off_flat @ p["Woff"].T + p["boff"]
        xu = upsample_linear_x2_ref(x)
        xun = jnp.einsum("oc,bct->bot", p["Wu"], xu, precision=lax.Precision.HIGHEST)
        pad = (p["Wc"].shape[-1] - 1) // 2
        y = lax.conv_general_dilated(xun, p["Wc"], window_strides=(1,),
                                     padding=[(pad, pad)],
                                     dimension_numbers=("NCH", "OIH", "NCH"),
                                     precision=lax.Precision.HIGHEST)
        y = y + p["bias"][None, :, None] + off_res[:, :, None] / 100.0
        if p["apply_act"]:
            y = jnp.where(y >= 0.0, y, 0.2 * y)
        x = y
    if meta["channel_base"][0] == 4:
        x = x[:, :-1, :]
    return x


if __name__ == "__main__":
    # synthetic "args" (small versions of the repo defaults)
    num_layers = 2
    kernel_size = 3            # odd; padding = (k-1)//2
    skeleton_dist = 1
    typeofchannel = 3          # channel_base[0] == 3 -> no last-channel trim
    B = 2
    T_in = 8
    # padding_mode='zeros', upsampling='linear', skeleton_pool='mean'

    # small 7-joint skeleton: 6 edges (+1 implicit global edge)
    topology = [(0, 1), (1, 2), (2, 3), (0, 4), (4, 5), (5, 6)]

    meta = build_encoder_meta(topology, num_layers, skeleton_dist, typeofchannel)

    key = jax.random.PRNGKey(0)
    key, kparams, kx, koff = jax.random.split(key, 4)
    layers = build_decoder_params(meta, num_layers, skeleton_dist, kernel_size, kparams)

    # f32 validation build; use compute_dtype=jnp.bfloat16 for the MXU-native production path
    # (then loosen the tolerance below — the reference runs at HIGHEST precision).
    fused = build_fused_operands(layers, T_in, compute_dtype=jnp.float32)

    # decoder input = encoder output: (B, enc.last_channel, T_in)
    x = jax.random.normal(kx, (B, meta["last_channel"], T_in), jnp.float32)

    # per-resolution static offsets offset[j]: (B, edge_num[j], 3*channel_base[j]//channel_base[0])
    offsets = []
    for j in range(num_layers):
        c_off = 3 * meta["channel_base"][j] // meta["channel_base"][0]
        kj = jax.random.fold_in(koff, j)
        offsets.append(jax.random.normal(kj, (B, meta["edge_num"][j], c_off), jnp.float32))

    @jax.jit
    def fwd(x_in, offs):
        return decoder_forward_pallas(x_in, offs, layers, fused, meta)

    out = jax.block_until_ready(fwd(x, tuple(offsets)))

    ref = reference_forward(x, offsets, layers, meta)
    assert out.shape == (B, layers[-1]["Wc"].shape[0], T_in * (2 ** num_layers)), out.shape
    err = float(jnp.max(jnp.abs(out - ref)))
    assert err < 2e-3, f"max abs err {err}"
    print("KERNEL_OK")
</pallas_src>

<mosaic_0001>
module attributes {stable_mosaic.version = 11 : i64} {
  func.func @_decoder_fused_kernel(%arg0: i32, %arg1: memref<1x40x128xf32, #tpu.memory_space<vmem>>, %arg2: memref<128x384xf32, #tpu.memory_space<vmem>>, %arg3: memref<32x120xf32, #tpu.memory_space<vmem>>, %arg4: memref<1x32x1xf32, #tpu.memory_space<vmem>>, %arg5: memref<128x384xf32, #tpu.memory_space<vmem>>, %arg6: memref<24x96xf32, #tpu.memory_space<vmem>>, %arg7: memref<1x24x1xf32, #tpu.memory_space<vmem>>, %arg8: memref<1x24x128xf32, #tpu.memory_space<vmem>>, %arg9: memref<120x128xf32, #tpu.memory_space<vmem>>) attributes {dimension_semantics = [#tpu.dimension_semantics<parallel>], iteration_bounds = array<i64: 2>, scalar_prefetch = 0 : i64, scratch_operands = 1 : i64, tpu.core_type = #tpu.core_type<tc>, window_params = [{transform_indices = @transform_0, window_bounds = array<i64: 1, 40, 128>}, {pipeline_mode = #tpu.pipeline_mode<synchronous>, transform_indices = @transform_1, window_bounds = array<i64: 128, 384>}, {pipeline_mode = #tpu.pipeline_mode<synchronous>, transform_indices = @transform_2, window_bounds = array<i64: 32, 120>}, {transform_indices = @transform_3, window_bounds = array<i64: 1, 32, 1>}, {pipeline_mode = #tpu.pipeline_mode<synchronous>, transform_indices = @transform_4, window_bounds = array<i64: 128, 384>}, {pipeline_mode = #tpu.pipeline_mode<synchronous>, transform_indices = @transform_5, window_bounds = array<i64: 24, 96>}, {transform_indices = @transform_6, window_bounds = array<i64: 1, 24, 1>}, {transform_indices = @transform_7, window_bounds = array<i64: 1, 24, 128>}]} {
    %c0 = arith.constant 0 : index
    %c0_0 = arith.constant 0 : index
    %c0_1 = arith.constant 0 : index
    %0 = vector.load %arg1[%c0, %c0_0, %c0_1] : memref<1x40x128xf32, #tpu.memory_space<vmem>>, vector<1x40x128xf32>
    %1 = vector.shape_cast %0 : vector<1x40x128xf32> to vector<40x128xf32>
    %c0_2 = arith.constant 0 : index
    %c0_3 = arith.constant 0 : index
    %2 = vector.load %arg2[%c0_2, %c0_3] : memref<128x384xf32, #tpu.memory_space<vmem>>, vector<128x384xf32>
    %cst = arith.constant dense<0.000000e+00> : vector<40x384xf32>
    %3 = tpu.matmul %1, %2, %cst {dimension_numbers = #tpu.dot_dimension_numbers<[1], [0], [0], [1], [0, 0, 1, 1], [], []>} : vector<40x128xf32>, vector<128x384xf32>, vector<40x384xf32> -> vector<40x384xf32>
    %4 = vector.extract_strided_slice %3 {offsets = [0, 0], sizes = [40, 128], strides = [1, 1]} : vector<40x384xf32> to vector<40x128xf32>
    %c0_4 = arith.constant 0 : index
    %c0_5 = arith.constant 0 : index
    %5 = vector.load %arg9[%c0_4, %c0_5] : memref<120x128xf32, #tpu.memory_space<vmem>>, vector<40x128xf32>
    tpu.vector_store %arg9[%c0_4, %c0_5], %4 {strides = array<i32>} : memref<120x128xf32, #tpu.memory_space<vmem>>, vector<40x128xf32>,
    %6 = vector.extract_strided_slice %3 {offsets = [0, 128], sizes = [40, 128], strides = [1, 1]} : vector<40x384xf32> to vector<40x128xf32>
    %c40 = arith.constant 40 : index
    %c0_6 = arith.constant 0 : index
    %7 = vector.load %arg9[%c40, %c0_6] : memref<120x128xf32, #tpu.memory_space<vmem>>, vector<40x128xf32>
    tpu.vector_store %arg9[%c40, %c0_6], %6 {strides = array<i32>} : memref<120x128xf32, #tpu.memory_space<vmem>>, vector<40x128xf32>,
    %8 = vector.extract_strided_slice %3 {offsets = [0, 256], sizes = [40, 128], strides = [1, 1]} : vector<40x384xf32> to vector<40x128xf32>
    %c80 = arith.constant 80 : index
    %c0_7 = arith.constant 0 : index
    %9 = vector.load %arg9[%c80, %c0_7] : memref<120x128xf32, #tpu.memory_space<vmem>>, vector<40x128xf32>
    tpu.vector_store %arg9[%c80, %c0_7], %8 {strides = array<i32>} : memref<120x128xf32, #tpu.memory_space<vmem>>, vector<40x128xf32>,
    %c0_8 = arith.constant 0 : index
    %c0_9 = arith.constant 0 : index
    %10 = vector.load %arg3[%c0_8, %c0_9] : memref<32x120xf32, #tpu.memory_space<vmem>>, vector<32x120xf32>
    %c0_10 = arith.constant 0 : index
    %c0_11 = arith.constant 0 : index
    %11 = vector.load %arg9[%c0_10, %c0_11] : memref<120x128xf32, #tpu.memory_space<vmem>>, vector<120x128xf32>
    %cst_12 = arith.constant dense<0.000000e+00> : vector<32x128xf32>
    %12 = tpu.matmul %10, %11, %cst_12 {dimension_numbers = #tpu.dot_dimension_numbers<[1], [0], [0], [1], [0, 0, 1, 1], [], []>} : vector<32x120xf32>, vector<120x128xf32>, vector<32x128xf32> -> vector<32x128xf32>
    %c0_13 = arith.constant 0 : index
    %c0_14 = arith.constant 0 : index
    %c0_15 = arith.constant 0 : index
    %13 = vector.load %arg4[%c0_13, %c0_14, %c0_15] : memref<1x32x1xf32, #tpu.memory_space<vmem>>, vector<1x32x1xf32>
    %14 = vector.shape_cast %13 : vector<1x32x1xf32> to vector<32x1xf32>
    %15 = vector.broadcast %14 : vector<32x1xf32> to vector<32x128xf32>
    %16 = arith.addf %12, %15 : vector<32x128xf32>
    %cst_16 = arith.constant 0.000000e+00 : f32
    %17 = vector.broadcast %cst_16 : f32 to vector<32x128xf32>
    %18 = arith.cmpf oge, %16, %17 : vector<32x128xf32>
    %cst_17 = arith.constant 2.000000e-01 : f32
    %19 = vector.broadcast %cst_17 : f32 to vector<32x128xf32>
    %20 = arith.mulf %19, %16 : vector<32x128xf32>
    %21 = arith.select %18, %16, %20 : vector<32x128xi1>, vector<32x128xf32>
    %c0_18 = arith.constant 0 : index
    %c0_19 = arith.constant 0 : index
    %22 = vector.load %arg5[%c0_18, %c0_19] : memref<128x384xf32, #tpu.memory_space<vmem>>, vector<128x384xf32>
    %cst_20 = arith.constant dense<0.000000e+00> : vector<32x384xf32>
    %23 = tpu.matmul %21, %22, %cst_20 {dimension_numbers = #tpu.dot_dimension_numbers<[1], [0], [0], [1], [0, 0, 1, 1], [], []>} : vector<32x128xf32>, vector<128x384xf32>, vector<32x384xf32> -> vector<32x384xf32>
    %24 = vector.extract_strided_slice %23 {offsets = [0, 0], sizes = [32, 128], strides = [1, 1]} : vector<32x384xf32> to vector<32x128xf32>
    %c0_21 = arith.constant 0 : index
    %c0_22 = arith.constant 0 : index
    %25 = vector.load %arg9[%c0_21, %c0_22] : memref<120x128xf32, #tpu.memory_space<vmem>>, vector<32x128xf32>
    tpu.vector_store %arg9[%c0_21, %c0_22], %24 {strides = array<i32>} : memref<120x128xf32, #tpu.memory_space<vmem>>, vector<32x128xf32>,
    %26 = vector.extract_strided_slice %23 {offsets = [0, 128], sizes = [32, 128], strides = [1, 1]} : vector<32x384xf32> to vector<32x128xf32>
    %c32 = arith.constant 32 : index
    %c0_23 = arith.constant 0 : index
    %27 = vector.load %arg9[%c32, %c0_23] : memref<120x128xf32, #tpu.memory_space<vmem>>, vector<32x128xf32>
    tpu.vector_store %arg9[%c32, %c0_23], %26 {strides = array<i32>} : memref<120x128xf32, #tpu.memory_space<vmem>>, vector<32x128xf32>,
    %28 = vector.extract_strided_slice %23 {offsets = [0, 256], sizes = [32, 128], strides = [1, 1]} : vector<32x384xf32> to vector<32x128xf32>
    %c64 = arith.constant 64 : index
    %c0_24 = arith.constant 0 : index
    %29 = vector.load %arg9[%c64, %c0_24] : memref<120x128xf32, #tpu.memory_space<vmem>>, vector<32x128xf32>
    tpu.vector_store %arg9[%c64, %c0_24], %28 {strides = array<i32>} : memref<120x128xf32, #tpu.memory_space<vmem>>, vector<32x128xf32>,
    %c0_25 = arith.constant 0 : index
    %c0_26 = arith.constant 0 : index
    %30 = vector.load %arg6[%c0_25, %c0_26] : memref<24x96xf32, #tpu.memory_space<vmem>>, vector<24x96xf32>
    %c0_27 = arith.constant 0 : index
    %c0_28 = arith.constant 0 : index
    %31 = vector.load %arg9[%c0_27, %c0_28] : memref<120x128xf32, #tpu.memory_space<vmem>>, vector<96x128xf32>
    %cst_29 = arith.constant dense<0.000000e+00> : vector<24x128xf32>
    %32 = tpu.matmul %30, %31, %cst_29 {dimension_numbers = #tpu.dot_dimension_numbers<[1], [0], [0], [1], [0, 0, 1, 1], [], []>} : vector<24x96xf32>, vector<96x128xf32>, vector<24x128xf32> -> vector<24x128xf32>
    %c0_30 = arith.constant 0 : index
    %c0_31 = arith.constant 0 : index
    %c0_32 = arith.constant 0 : index
    %33 = vector.load %arg7[%c0_30, %c0_31, %c0_32] : memref<1x24x1xf32, #tpu.memory_space<vmem>>, vector<1x24x1xf32>
    %34 = vector.shape_cast %33 : vector<1x24x1xf32> to vector<24x1xf32>
    %35 = vector.broadcast %34 : vector<24x1xf32> to vector<24x128xf32>
    %36 = arith.addf %32, %35 : vector<24x128xf32>
    %c0_33 = arith.constant 0 : index
    %c0_34 = arith.constant 0 : index
    %c0_35 = arith.constant 0 : index
    %37 = vector.load %arg8[%c0_33, %c0_34, %c0_35] : memref<1x24x128xf32, #tpu.memory_space<vmem>>, vector<1x24x128xf32>
    %38 = vector.shape_cast %37 : vector<1x24x128xf32> to vector<24x128xf32>
    %39 = vector.shape_cast %36 : vector<24x128xf32> to vector<1x24x128xf32>
    tpu.vector_store %arg8[%c0_33, %c0_34, %c0_35], %39 {strides = array<i32>} : memref<1x24x128xf32, #tpu.memory_space<vmem>>, vector<1x24x128xf32>,
    return
  }
  func.func @transform_0(%arg0: i32) -> (i32, i32, i32) {
    %c0_i32 = arith.constant 0 : i32
    %c0_i32_0 = arith.constant 0 : i32
    %c0_i32_1 = arith.constant 0 : i32
    return %arg0, %c0_i32, %c0_i32_0 : i32, i32, i32
  }
  func.func @transform_1(%arg0: i32) -> (i32, i32) {
    %c0_i32 = arith.constant 0 : i32
    %c0_i32_0 = arith.constant 0 : i32
    %c0_i32_1 = arith.constant 0 : i32
    return %c0_i32, %c0_i32_0 : i32, i32
  }
  func.func @transform_2(%arg0: i32) -> (i32, i32) {
    %c0_i32 = arith.constant 0 : i32
    %c0_i32_0 = arith.constant 0 : i32
    %c0_i32_1 = arith.constant 0 : i32
    return %c0_i32, %c0_i32_0 : i32, i32
  }
  func.func @transform_3(%arg0: i32) -> (i32, i32, i32) {
    %c0_i32 = arith.constant 0 : i32
    %c0_i32_0 = arith.constant 0 : i32
    %c0_i32_1 = arith.constant 0 : i32
    return %arg0, %c0_i32, %c0_i32_0 : i32, i32, i32
  }
  func.func @transform_4(%arg0: i32) -> (i32, i32) {
    %c0_i32 = arith.constant 0 : i32
    %c0_i32_0 = arith.constant 0 : i32
    %c0_i32_1 = arith.constant 0 : i32
    return %c0_i32, %c0_i32_0 : i32, i32
  }
  func.func @transform_5(%arg0: i32) -> (i32, i32) {
    %c0_i32 = arith.constant 0 : i32
    %c0_i32_0 = arith.constant 0 : i32
    %c0_i32_1 = arith.constant 0 : i32
    return %c0_i32, %c0_i32_0 : i32, i32
  }
  func.func @transform_6(%arg0: i32) -> (i32, i32, i32) {
    %c0_i32 = arith.constant 0 : i32
    %c0_i32_0 = arith.constant 0 : i32
    %c0_i32_1 = arith.constant 0 : i32
    return %arg0, %c0_i32, %c0_i32_0 : i32, i32, i32
  }
  func.func @transform_7(%arg0: i32) -> (i32, i32, i32) {
    %c0_i32 = arith.constant 0 : i32
    %c0_i32_0 = arith.constant 0 : i32
    %c0_i32_1 = arith.constant 0 : i32
    return %arg0, %c0_i32, %c0_i32_0 : i32, i32, i32
  }
}

</mosaic_0001>

<bundles_post_ra>
// kernel: fwd.1
= control target key start
LH: loop header
LB: loop body
LE: loop exit
PB: predicated region body
PF: predicated region fallthrough
CT: control target
= control target key end

     0   :  { %12 = vsyncpa [#allocation4], 0  ;;  %s1724_s24 = smov 0   ;;  %s2010_s0 = inlined_call_operand.vmem [shape: f32[2,40,128], index: 0, kind: input, shape index: {}]   ;;  %s2011_s1 = inlined_call_operand.vmem [shape: f32[128,384], index: 1, kind: input, shape index: {}]   ;;  %s2012_s2 = inlined_call_operand.vmem [shape: f32[32,120], index: 2, kind: input, shape index: {}]   ;;  %s2013_s3 = inlined_call_operand.vmem [shape: f32[2,32,1], index: 3, kind: input, shape index: {}]   ;;  %s2014_s4 = inlined_call_operand.hbm [shape: f32[128,384], index: 4, kind: input, shape index: {}]   ;;  %s2015_s5 = inlined_call_operand.vmem [shape: f32[24,96], index: 5, kind: input, shape index: {}]   ;;  %s2016_s6 = inlined_call_operand.vmem [shape: f32[2,24,1], index: 6, kind: input, shape index: {}]   ;;  %s2017_s7 = inlined_call_operand.vmem [shape: f32[2,24,128], index: 7, kind: output, shape index: {}]  }
   0x1 LB: > { %s1730_s25 = sadd.s32 4294967295, %s1675_s24   ;;  %p1193_p0 = scmp.ge.s32.totalorder %s1675_s24, 1  ;;  %s1675_s24 = sphi %s1724_s24, %s18_s24  }
   0x2   : > { %p211_p1 = scmp.lt.s32.totalorder %s1675_s24, 3  ;;  %s1677_s26 = smov [#allocation3]  }
   0x3   : > { %s229_s27 = sshll.u32 %s1677_s26, 4  ;;  %p2018_p3 = scmp.eq.s32.totalorder %s1730_s25, 0  ;;  %s230_s27 = int_to_ptr.vmem [resolvable:$true] %s229_s27 }
   0x4   : > { %p1734_p2 = pnand %p1193_p0, %p211_p1  ;;  %s1637_s9 = scalar_lea.hbm %s2014_s4, 6144 }
   0x5   : > { %p1638_p6 = scmp.ne.s32.totalorder %s2014_s4, %s1637_s9  ;;  %p1644_p10 = scmp.lt.u32.totalorder %s1637_s9, %s2014_s4 }
   0x6   : > { %s2020_s28 = scalar_select %p1734_p2, 1, 0 }
   0x7   : > { %p1614_p4 = pneg %p1734_p2 }
   0x9   : > { %p1743_p5 = pnand %p2018_p3, %p1614_p4 }
   0xb   : > { %p1639_p7 = pneg %p1743_p5 }
   0xd   : > { %p1640_p8 = pnand %p1639_p7, %p1638_p6 }
   0xf   : > { %p1641_p9 = pneg %p1640_p8 }
  0x11   : > { %p1646_p11 = pnand %p1644_p10, %p1641_p9 }
  0x13   : > { %1649 = shalt.err (!%p1646_p11)
}
  0x14   : > { %s1650_s14 = scalar_lea.vmem %s230_s27, 6144  ;;  %p1658_p1 = scmp.lt.s32.totalorder %s230_s27, %s230_s27 }
  0x15   : > { %p1651_p12 = scmp.ne.s32.totalorder %s230_s27, %s1650_s14  ;;  %p1659_p4 = scmp.lt.s32.totalorder %s1650_s14, %s1650_s14 }
  0x17   : > { %p1653_p13 = pnand %p1651_p12, %p1639_p7  ;;  %p1660_p3 = por %p1659_p4, %p1658_p1 }
  0x19   : > { %p1654_p0 = pneg %p1653_p13 }
  0x1b   : > { %p1661_p2 = pnand %p1660_p3, %p1654_p0 }
  0x1d   : > { %1664 = shalt.err (!%p1661_p2)
}
  0x1e   : > { %s1678_s15 = smov 384   ;;  %s1679_s16 = smov 24  }
  0x1f   : > { %1617 = dma.hbm_to_vmem [thread:$0]  (!%p1743_p5), %s2014_s4, 6144, %s230_s27, [#allocation4], %s1678_s15, %s1678_s15, %s1679_s16  }
  0x20   : > { %p2022_p6 = scmp.ne.s32.totalorder %s2020_s28, 0 }
  0x21   : > { %p2023_p8 = scmp.eq.s32.totalorder (!%p2022_p6), %s1730_s25, 0 }
  0x22   : > { %272 = sbr.rel (%p2022_p6) target bundleno = 1015 (0x3f7), region = 48 }
  0x29   : > { %1670 = dma.done.wait (%p2023_p8), [#allocation4], 6144   ;;  %p2024_p7 = pmov %p2023_p8 }
  0x2a   : > { %v1680_v0 = vmov 0.0|0.0   ;;  %v1681_v1 = vmov 0.0   ;;  %vm1682_vm0 = vmmov 0   ;;  %v340_v2 = vld [vmem:[%s2011_s1 + $0x8] sm:$0xff]  ;;  %v343_v3 = vld [vmem:[%s2011_s1 + $0x20] sm:$0xff]  ;;  %v342_v6 = vld [vmem:[%s2011_s1 + $0x18] sm:$0xff] }
  0x2b   : > { %1672 = vsyncadd (%p2024_p7), [#allocation4], 4294961152  ;;  %1474 = vmatprep.subr.bf16.mxu1 %v1680_v0  ;;  %451 = vmatprep.mubr.f32.mxu0 %v1681_v1  ;;  %v339_v4 = vld [vmem:[%s2011_s1] sm:$0xff]  ;;  %v1442_v5 = vpack.c.bf16 %v343_v3, %v340_v2  ;;  %v346_v7 = vld [vmem:[%s2011_s1 + $0x38] sm:$0xff]  ;;  %p314_p2 = scmp.lt.s32.totalorder %s1730_s25, 1  ;;  %vm630_vm1 = vcmask 982016  }
  0x2c   : > { %1320 = vmatprep.mubr.msk.f32.mxu1 %vm1682_vm0, %v1681_v1  ;;  %v349_v8 = vld [vmem:[%s2011_s1 + $0x50] sm:$0xff]  ;;  %v1444_v9 = vpack.c.bf16 %v342_v6, %v339_v4  ;;  %v348_v12 = vld [vmem:[%s2011_s1 + $0x48] sm:$0xff]  ;;  %v355_v14 = vld [vmem:[%s2011_s1 + $0x80] sm:$0xff]  ;;  %vm1007_vm6 = vcmask 785408  }
  0x2d   : > { %v1446_v10 = vpack.c.bf16 %v349_v8, %v346_v7  ;;  %v345_v11 = vld [vmem:[%s2011_s1 + $0x30] sm:$0xff]  ;;  %v352_v13 = vld [vmem:[%s2011_s1 + $0x68] sm:$0xff]  ;;  %1443 = vmatprep.subr.bf16.mxu0 %v1442_v5  ;;  %v351_v17 = vld [vmem:[%s2011_s1 + $0x60] sm:$0xff]  ;;  %s2026_s25 = smov (!%p314_p2, %s1730_s25), 1 }
  0x2e   : > { %1445 = vmatpush1.bf16.msra.mxu0 %v1444_v9  ;;  %v1448_v15 = vpack.c.bf16 %v348_v12, %v345_v11  ;;  %v1450_v16 = vpack.c.bf16 %v355_v14, %v352_v13  ;;  %v354_v18 = vld [vmem:[%s2011_s1 + $0x78] sm:$0xff]  ;;  %v361_v20 = vld [vmem:[%s2011_s1 + $0xb0] sm:$0xff]  ;;  %v344_v22 = vld [vmem:[%s2011_s1 + $0x28] sm:$0xff]  ;;  %s1608_s23 = smul.u32 40, %s2026_s25  ;;  %s1212_s16 = sshll.u32 %s2026_s25, 5 }
  0x2f   : > { %1447 = vmatprep.subr.bf16.mxu0 %v1446_v10  ;;  %v358_v19 = vld [vmem:[%s2011_s1 + $0x98] sm:$0xff]  ;;  %v341_v21 = vld [vmem:[%s2011_s1 + $0x10] sm:$0xff]  ;;  %v1452_v23 = vpack.c.bf16 %v354_v18, %v351_v17  ;;  %v347_v25 = vld [vmem:[%s2011_s1 + $0x40] sm:$0xff]  ;;  %s1609_s17 = smul.u32 24, %s2026_s25  ;;  %s323_s20 = scalar_lea.vmem %s2013_s3, %s1212_s16 }
  0x30   : > { %v1475_v24 = vpack.c.bf16 %v344_v22, %v341_v21  ;;  %v1454_v26 = vpack.c.bf16 %v361_v20, %v358_v19  ;;  %v357_v27 = vld [vmem:[%s2011_s1 + $0x90] sm:$0xff]  ;;  %v360_v28 = vld [vmem:[%s2011_s1 + $0xa8] sm:$0xff]  ;;  %v350_v29 = vld [vmem:[%s2011_s1 + $0x58] sm:$0xff]  ;;  %s318_s9 = scalar_lea.vmem %s2010_s0, %s1608_s23  ;;  %v1683_v21 = vmov 0  }
  0x31   : > { %v364_v30 = vld [vmem:[%s2011_s1 + $0xc8] sm:$0xff]  ;;  %v367_v31 = vld [vmem:[%s2011_s1 + $0xe0] sm:$0xff]  ;;  %v1478_v32 = vpack.c.bf16 %v350_v29, %v347_v25  ;;  %v353_v33 = vld [vmem:[%s2011_s1 + $0x70] sm:$0xff]  ;;  %v1456_v35 = vpack.c.bf16 %v360_v28, %v357_v27  ;;  %1635 = vset.pattern.permute.xlu0 %v1683_v21  ;;  %1636 = vset.pattern.permute.xlu1 %v1683_v21  ;;  %s1961_s23 = scalar_lea.vmem %s2016_s6, %s1609_s17  ;;  %s333_s18 = scalar_lea.vmem %s2017_s7, %s1609_s17 }
  0x32   : > { %1449 = vmatpush1.bf16.msra.mxu0 %v1448_v15  ;;  %1476 = vmatpush3.bf16.msra.mxu1 %v1475_v24  ;;  %v356_v34 = vld [vmem:[%s2011_s1 + $0x88] sm:$0xff]  ;;  %v1458_v36 = vpack.c.bf16 %v367_v31, %v364_v30  ;;  %v363_v37 = vld [vmem:[%s2011_s1 + $0xc0] sm:$0xff]  ;;  %v366_v38 = vld [vmem:[%s2011_s1 + $0xd8] sm:$0xff] }
  0x33   : > { %1451 = vmatprep.subr.bf16.mxu0 %v1450_v16  ;;  %1477 = vmatprep.subr.bf16.mxu1 %v1680_v0  ;;  %v370_v39 = vld [vmem:[%s2011_s1 + $0xf8] sm:$0xff]  ;;  %v373_v40 = vld [vmem:[%s2011_s1 + $0x110] sm:$0xff]  ;;  %v1481_v41 = vpack.c.bf16 %v356_v34, %v353_v33  ;;  %v359_v42 = vld [vmem:[%s2011_s1 + $0xa0] sm:$0xff]  ;;  %v1460_v44 = vpack.c.bf16 %v366_v38, %v363_v37 }
  0x34   : > { %v362_v43 = vld [vmem:[%s2011_s1 + $0xb8] sm:$0xff]  ;;  %v1462_v45 = vpack.c.bf16 %v373_v40, %v370_v39  ;;  %v369_v46 = vld [vmem:[%s2011_s1 + $0xf0] sm:$0xff]  ;;  %v372_v47 = vld [vmem:[%s2011_s1 + $0x108] sm:$0xff] }
  0x35   : > { %v376_v48 = vld [vmem:[%s2011_s1 + $0x128] sm:$0xff]  ;;  %v379_v49 = vld [vmem:[%s2011_s1 + $0x140] sm:$0xff]  ;;  %v1484_v50 = vpack.c.bf16 %v362_v43, %v359_v42  ;;  %v365_v51 = vld [vmem:[%s2011_s1 + $0xd0] sm:$0xff]  ;;  %v1464_v53 = vpack.c.bf16 %v372_v47, %v369_v46 }
  0x36   : > { %1453 = vmatpush1.bf16.msra.mxu0 %v1452_v23  ;;  %1479 = vmatpush3.bf16.msra.mxu1 %v1478_v32  ;;  %v368_v52 = vld [vmem:[%s2011_s1 + $0xe8] sm:$0xff]  ;;  %v1466_v54 = vpack.c.bf16 %v379_v49, %v376_v48  ;;  %v375_v55 = vld [vmem:[%s2011_s1 + $0x120] sm:$0xff]  ;;  %v378_v56 = vld [vmem:[%s2011_s1 + $0x138] sm:$0xff] }
  0x37   : > { %1455 = vmatprep.subr.bf16.mxu0 %v1454_v26  ;;  %1480 = vmatprep.subr.bf16.mxu1 %v1680_v0  ;;  %v382_v57 = vld [vmem:[%s2011_s1 + $0x158] sm:$0xff]  ;;  %v385_v58 = vld [vmem:[%s2011_s1 + $0x170] sm:$0xff]  ;;  %v1487_v59 = vpack.c.bf16 %v368_v52, %v365_v51  ;;  %v371_v60 = vld [vmem:[%s2011_s1 + $0x100] sm:$0xff]  ;;  %v1468_v62 = vpack.c.bf16 %v378_v56, %v375_v55 }
  0x38   : > { %v374_v61 = vld [vmem:[%s2011_s1 + $0x118] sm:$0xff]  ;;  %v1470_v63 = vpack.c.bf16 %v385_v58, %v382_v57  ;;  %v381_v2 = vld [vmem:[%s2011_s1 + $0x150] sm:$0xff]  ;;  %v384_v3 = vld [vmem:[%s2011_s1 + $0x168] sm:$0xff] }
  0x39   : > { %v1490_v4 = vpack.c.bf16 %v374_v61, %v371_v60  ;;  %v377_v5 = vld [vmem:[%s2011_s1 + $0x130] sm:$0xff]  ;;  %v380_v6 = vld [vmem:[%s2011_s1 + $0x148] sm:$0xff]  ;;  %v1472_v7 = vpack.c.bf16 %v384_v3, %v381_v2  ;;  %v383_v9 = vld [vmem:[%s2011_s1 + $0x160] sm:$0xff] }
  0x3a   : > { %1457 = vmatpush1.bf16.msra.mxu0 %v1456_v35  ;;  %1482 = vmatpush3.bf16.msra.mxu1 %v1481_v41  ;;  %v1493_v8 = vpack.c.bf16 %v380_v6, %v377_v5  ;;  %v386_v10 = vld [vmem:[%s2011_s1 + $0x178] sm:$0xff]  ;;  %v334_v11 = vld [vmem:[%s318_s9] sm:$0xff]  ;;  %v335_v13 = vld [vmem:[%s318_s9 + $0x8] sm:$0xff] }
  0x3b   : > { %1459 = vmatprep.subr.bf16.mxu0 %v1458_v36  ;;  %1483 = vmatprep.subr.bf16.mxu1 %v1680_v0  ;;  %v1496_v12 = vpack.c.bf16 %v386_v10, %v383_v9  ;;  %v336_v14 = vld [vmem:[%s318_s9 + $0x10] sm:$0xff]  ;;  %v337_v15 = vld [vmem:[%s318_s9 + $0x18] sm:$0xff]  ;;  %v338_v16 = vld [vmem:[%s318_s9 + $0x20] sm:$0xff] }
  0x3c   : > { %v587_v17 = vld [vmem:[%s2012_s2] sm:$0xff]  ;;  %v741_v18 = vld [vmem:[#allocation3 + $0x8] sm:$0xff]  ;;  %v743_v23 = vld [vmem:[#allocation3 + $0x18] sm:$0xff] }
  0x3d   : > { %v744_v19 = vld [vmem:[#allocation3 + $0x20] sm:$0xff]  ;;  %v608_v25 = vld [vmem:[%s323_s20 + $0x10] sm:$0xff]  ;;  %v607_v27 = vld [vmem:[%s323_s20 + $0x8] sm:$0xff] }
  0x3e   : > { %1461 = vmatpush1.bf16.msra.mxu0 %v1460_v44  ;;  %1485 = vmatpush3.bf16.msra.mxu1 %v1484_v50  ;;  %v740_v20 = vld [vmem:[#allocation3] sm:$0xff]  ;;  %v1526_v22 = vpack.c.bf16 %v744_v19, %v741_v18  ;;  %v609_v28 = vld [vmem:[%s323_s20 + $0x18] sm:$0xff]  ;;  %v750_v30 = vld [vmem:[#allocation3 + $0x50] sm:$0xff] }
  0x3f   : > { %1463 = vmatprep.subr.bf16.mxu0 %v1462_v45  ;;  %1486 = vmatprep.subr.bf16.mxu1 %v1680_v0  ;;  %v606_v24 = vld [vmem:[%s323_s20] sm:$0xff]  ;;  %v1528_v26 = vpack.c.bf16 %v743_v23, %v740_v20  ;;  %v747_v29 = vld [vmem:[#allocation3 + $0x38] sm:$0xff]  ;;  %v746_v32 = vld [vmem:[#allocation3 + $0x30] sm:$0xff] }
  0x40   : > { %612 = vperm.xlu0 %1635, %v606_v24   ;;  %622 = vperm.xlu1 %1636, %v608_v25   ;;  %v1530_v31 = vpack.c.bf16 %v750_v30, %v747_v29  ;;  %v749_v33 = vld [vmem:[#allocation3 + $0x48] sm:$0xff]  ;;  %v756_v36 = vld [vmem:[#allocation3 + $0x80] sm:$0xff]  ;;  %v755_v40 = vld [vmem:[#allocation3 + $0x78] sm:$0xff] }
  0x41   : > { %v1532_v34 = vpack.c.bf16 %v749_v33, %v746_v32  ;;  %v753_v35 = vld [vmem:[#allocation3 + $0x68] sm:$0xff]  ;;  %v989_v37 = vld [vmem:[%s1961_s23] sm:$0xff]  ;;  %v759_v42 = vld [vmem:[#allocation3 + $0x98] sm:$0xff] }
  0x42   : > { %1465 = vmatpush1.bf16.msra.mxu0 %v1464_v53  ;;  %1488 = vmatpush3.bf16.msra.mxu1 %v1487_v59  ;;  %v1534_v38 = vpack.c.bf16 %v756_v36, %v753_v35  ;;  %v752_v39 = vld [vmem:[#allocation3 + $0x60] sm:$0xff]  ;;  %v990_v41 = vld [vmem:[%s1961_s23 + $0x8] sm:$0xff]  ;;  %v762_v43 = vld [vmem:[#allocation3 + $0xb0] sm:$0xff] }
  0x43   : > { %1467 = vmatprep.subr.bf16.mxu0 %v1466_v54  ;;  %1489 = vmatprep.subr.bf16.mxu1 %v1680_v0  ;;  %v1536_v44 = vpack.c.bf16 %v755_v40, %v752_v39  ;;  %v1538_v45 = vpack.c.bf16 %v762_v43, %v759_v42  ;;  %v758_v46 = vld [vmem:[#allocation3 + $0x90] sm:$0xff]  ;;  %v761_v47 = vld [vmem:[#allocation3 + $0xa8] sm:$0xff]  ;;  %v768_v49 = vld [vmem:[#allocation3 + $0xe0] sm:$0xff] }
  0x44   : > { %617 = vperm.xlu0 %1635, %v607_v27   ;;  %627 = vperm.xlu1 %1636, %v609_v28   ;;  %v765_v48 = vld [vmem:[#allocation3 + $0xc8] sm:$0xff]  ;;  %v991_v50 = vld [vmem:[%s1961_s23 + $0x10] sm:$0xff]  ;;  %v1540_v51 = vpack.c.bf16 %v761_v47, %v758_v46  ;;  %v764_v53 = vld [vmem:[#allocation3 + $0xc0] sm:$0xff] }
  0x45   : > { %v1542_v52 = vpack.c.bf16 %v768_v49, %v765_v48  ;;  %v767_v54 = vld [vmem:[#allocation3 + $0xd8] sm:$0xff]  ;;  %v774_v56 = vld [vmem:[#allocation3 + $0x110] sm:$0xff]  ;;  %v773_v60 = vld [vmem:[#allocation3 + $0x108] sm:$0xff] }
  0x46   : > { %1469 = vmatpush1.bf16.msra.mxu0 %v1468_v62  ;;  %1491 = vmatpush3.bf16.msra.mxu1 %v1490_v4  ;;  %v771_v55 = vld [vmem:[#allocation3 + $0xf8] sm:$0xff]  ;;  %v1544_v57 = vpack.c.bf16 %v767_v54, %v764_v53  ;;  %v770_v59 = vld [vmem:[#allocation3 + $0xf0] sm:$0xff]  ;;  %v777_v61 = vld [vmem:[#allocation3 + $0x128] sm:$0xff] }
  0x47   : > { %1471 = vmatprep.subr.bf16.mxu0 %v1470_v63  ;;  %1492 = vmatprep.subr.bf16.mxu1 %v1680_v0  ;;  %v1546_v58 = vpack.c.bf16 %v774_v56, %v771_v55  ;;  %v780_v62 = vld [vmem:[#allocation3 + $0x140] sm:$0xff]  ;;  %v1548_v63 = vpack.c.bf16 %v773_v60, %v770_v59  ;;  %v742_v30 = vld [vmem:[#allocation3 + $0x10] sm:$0xff]  ;;  %v751_v33 = vld [vmem:[#allocation3 + $0x58] sm:$0xff] }
  0x48   : > { %994 = vperm.xlu0 %1635, %v989_v37   ;;  %999 = vperm.xlu1 %1636, %v990_v41   ;;  %v1550_v2 = vpack.c.bf16 %v780_v62, %v777_v61  ;;  %v748_v32 = vld [vmem:[#allocation3 + $0x40] sm:$0xff]  ;;  %v588_v35 = vld [vmem:[%s2012_s2 + $0x8] sm:$0xff]  ;;  %v589_v36 = vld [vmem:[%s2012_s2 + $0x10] sm:$0xff] }
  0x49   : > { %v1562_v37 = vpack.c.bf16 %v751_v33, %v748_v32  ;;  %v757_v39 = vld [vmem:[#allocation3 + $0x88] sm:$0xff]  ;;  %v590_v40 = vld [vmem:[%s2012_s2 + $0x18] sm:$0xff]  ;;  %v760_v42 = vld [vmem:[#allocation3 + $0xa0] sm:$0xff] }
  0x4a   : > { %1473 = vmatpush1.bf16.msra.mxu0 %v1472_v7  ;;  %1494 = vmatpush3.bf16.msra.mxu1 %v1493_v8  ;;  %v763_v43 = vld [vmem:[#allocation3 + $0xb8] sm:$0xff]  ;;  %v769_v46 = vld [vmem:[#allocation3 + $0xe8] sm:$0xff]  ;;  %v772_v48 = vld [vmem:[#allocation3 + $0x100] sm:$0xff] }
  0x4b   : > { %1495 = vmatprep.subr.bf16.mxu1 %v1680_v0  ;;  %v775_v49 = vld [vmem:[#allocation3 + $0x118] sm:$0xff]  ;;  %v778_v53 = vld [vmem:[#allocation3 + $0x130] sm:$0xff]  ;;  %v781_v55 = vld [vmem:[#allocation3 + $0x148] sm:$0xff] }
  0x4c   : > { %1004 = vperm.xlu0 %1635, %v991_v50   ;;  %v1578_v50 = vpack.c.bf16 %v775_v49, %v772_v48  ;;  %v1582_v56 = vpack.c.bf16 %v781_v55, %v778_v53  ;;  %v782_v60 = vld [vmem:[#allocation3 + $0x150] sm:$0xff]  ;;  %v785_v61 = vld [vmem:[#allocation3 + $0x168] sm:$0xff]  ;;  %v784_v62 = vld [vmem:[#allocation3 + $0x160] sm:$0xff] }
  0x4d   : > { %452 = vmatmul.mubr.f32.vlgmr.msra.gmra.mrb[0].mxu0 %v334_v11 }
  0x4e   : > { %457 = vmatprep.mubr.f32.mxu0 %v1681_v1  ;;  %1497 = vmatpush3.bf16.msra.mxu1 %v1496_v12 }
  0x4f   : > { %1527 = vmatprep.subr.bf16.mxu1 %v1526_v22 }
  0x51   : > { %458 = vmatmul.mubr.f32.gmra.mrb[2].mxu0 %v335_v13  ;;  %1321 = vmatmul.mubr.f32.vlgmr.msra.gmra.mrb[0].mxu1 %v334_v11 }
  0x52   : > { %463 = vmatprep.mubr.f32.mxu0 %v1681_v1  ;;  %1323 = vmatprep.mubr.msk.f32.mxu1 %vm1682_vm0, %v1681_v1 }
  0x53   : > { %1529 = vmatpush1.bf16.msra.mxu1 %v1528_v26 }
  0x54   : > { %1531 = vmatprep.subr.bf16.mxu1 %v1530_v31  ;;  %v745_v31 = vld [vmem:[#allocation3 + $0x28] sm:$0xff] }
  0x55   : > { %464 = vmatmul.mubr.f32.gmra.mrb[4].mxu0 %v336_v14  ;;  %1324 = vmatmul.mubr.f32.gmra.mrb[2].mxu1 %v335_v13 }
  0x56   : > { %469 = vmatprep.mubr.f32.mxu0 %v1681_v1  ;;  %1326 = vmatprep.mubr.msk.f32.mxu1 %vm1682_vm0, %v1681_v1 }
  0x57   : > { %1533 = vmatpush1.bf16.msra.mxu1 %v1532_v34  ;;  %v1558_v34 = vpack.c.bf16 %v745_v31, %v742_v30 }
  0x58   : > { %1535 = vmatprep.subr.bf16.mxu1 %v1534_v38  ;;  %v754_v38 = vld [vmem:[#allocation3 + $0x70] sm:$0xff] }
  0x59   : > { %470 = vmatmul.mubr.f32.gmra.mrb[6].mxu0 %v337_v15  ;;  %1327 = vmatmul.mubr.f32.gmra.mrb[4].mxu1 %v336_v14  ;;  %v1566_v41 = vpack.c.bf16 %v757_v39, %v754_v38 }
  0x5a   : > { %475 = vmatprep.mubr.f32.mxu0 %v1681_v1  ;;  %1329 = vmatprep.mubr.msk.f32.mxu1 %vm1682_vm0, %v1681_v1 }
  0x5b   : > { %1537 = vmatpush1.bf16.msra.mxu1 %v1536_v44  ;;  %v1570_v44 = vpack.c.bf16 %v763_v43, %v760_v42  ;;  %v974_v42 = vld [vmem:[%s2015_s5] sm:$0xff]  ;;  %v975_v43 = vld [vmem:[%s2015_s5 + $0x8] sm:$0xff] }
  0x5c   : > { %1539 = vmatprep.subr.bf16.mxu1 %v1538_v45  ;;  %v766_v45 = vld [vmem:[#allocation3 + $0xd0] sm:$0xff] }
  0x5d   : > { %476 = vmatmul.mubr.f32.gmra.mrb[8].mxu0 %v338_v16  ;;  %1330 = vmatmul.mubr.f32.gmra.mrb[6].mxu1 %v337_v15  ;;  %v1574_v47 = vpack.c.bf16 %v769_v46, %v766_v45 }
  0x5e   : > { %1332 = vmatprep.mubr.msk.f32.mxu1 %vm1682_vm0, %v1681_v1  ;;  %1365 = vmatprep.mubr.msk.f32.mxu0 %vm630_vm1, %v587_v17 }
  0x5f   : > { %1541 = vmatpush1.bf16.msra.mxu1 %v1540_v51  ;;  %v776_v51 = vld [vmem:[#allocation3 + $0x120] sm:$0xff] }
  0x60   : > { %1543 = vmatprep.subr.bf16.mxu1 %v1542_v52  ;;  %v779_v52 = vld [vmem:[#allocation3 + $0x138] sm:$0xff] }
  0x61   : > { %1333 = vmatmul.mubr.f32.gmra.mrb[8].mxu1 %v338_v16  ;;  %v1552_v54 = vpack.c.bf16 %v779_v52, %v776_v51 }
  0x62   : > { %852 = vmatprep.mubr.f32.mxu1 %v1681_v1 }
  0x63   : > { %1545 = vmatpush1.bf16.msra.mxu1 %v1544_v57  ;;  %v783_v57 = vld [vmem:[#allocation3 + $0x158] sm:$0xff] }
  0x64   : > { %1547 = vmatprep.subr.bf16.mxu1 %v1546_v58  ;;  %v786_v58 = vld [vmem:[#allocation3 + $0x170] sm:$0xff] }
  0x65   : > { %v1554_v59 = vpack.c.bf16 %v786_v58, %v783_v57 }
  0x67   : > { %1549 = vmatpush1.bf16.msra.mxu1 %v1548_v63  ;;  %v1556_v63 = vpack.c.bf16 %v785_v61, %v782_v60 }
  0x68   : > { %1551 = vmatprep.subr.bf16.mxu1 %v1550_v2  ;;  %v787_v2 = vld [vmem:[#allocation3 + $0x178] sm:$0xff] }
  0x6b   : > { %1553 = vmatpush1.bf16.msra.mxu1 %v1552_v54 }
  0x6c   : > { %1555 = vmatprep.subr.bf16.mxu1 %v1554_v59 }
  0x6f   : > { %1557 = vmatpush1.bf16.msra.mxu1 %v1556_v63 }
  0x70   : > { %1590 = vmatprep.subr.bf16.mxu1 %v1680_v0 }
 0x120   : > { %v453_v3 = vpop.f32.mrb[0].mxu0 }
 0x121   : > { %v455_v4 = vpop.f32.mrb[1].mxu0 }
 0x124   : > { %v459_v5 = vpop.f32.mrb[2].mxu0  ;;  %v548_v8 = vpop.f32.mrb[0].mxu1 }
 0x125   : > { %v1498_v6 = vpack.c.bf16 %v459_v5, %v453_v3  ;;  %v461_v7 = vpop.f32.mrb[3].mxu0  ;;  %v1322_v9 = vpop.f32.mrb[1].mxu1  ;;  %v1586_v3 = vpack.c.bf16 %v787_v2, %v784_v62 }
 0x126   : > { %v623_v5 = vpop.permute.xlu1 %622 }
 0x127   : > { %1499 = vmatprep.subr.bf16.mxu0 %v1498_v6 }
 0x128   : > { %v465_v10 = vpop.f32.mrb[4].mxu0  ;;  %1501 = vmatpush3.bf16.msra.mxu0 %v1498_v6  ;;  %v553_v13 = vpop.f32.mrb[2].mxu1 }
 0x129   : > { %v467_v11 = vpop.f32.mrb[5].mxu0  ;;  %v1518_v14 = vpack.c.bf16 %v553_v13, %v548_v8  ;;  %v1325_v15 = vpop.f32.mrb[3].mxu1 }
 0x12a   : > { %v1510_v12 = vpack.c.bf16 %v467_v11, %v461_v7  ;;  %v628_v11 = vpop.permute.xlu1 %627 }
 0x12c   : > { %v471_v16 = vpop.f32.mrb[6].mxu0  ;;  %v558_v19 = vpop.f32.mrb[4].mxu1 }
 0x12d   : > { %v1502_v17 = vpack.c.bf16 %v471_v16, %v465_v10  ;;  %v473_v18 = vpop.f32.mrb[7].mxu0  ;;  %v1328_v20 = vpop.f32.mrb[5].mxu1 }
 0x12e   : > { %v1000_v48 = vpop.permute.xlu1 %999 }
 0x12f   : > { %1503 = vmatprep.subr.bf16.mxu0 %v1502_v17 }
 0x130   : > { %v477_v21 = vpop.f32.mrb[8].mxu0  ;;  %1505 = vmatpush3.bf16.msra.mxu0 %v1502_v17  ;;  %v563_v25 = vpop.f32.mrb[6].mxu1 }
 0x131   : > { %v1506_v22 = vpack.c.bf16 %v455_v4, %v477_v21  ;;  %v479_v23 = vpop.f32.mrb[9].mxu0  ;;  %v1522_v26 = vpack.c.bf16 %v563_v25, %v558_v19  ;;  %v1331_v27 = vpop.f32.mrb[7].mxu1 }
 0x132   : > { %v1514_v24 = vpack.c.bf16 %v479_v23, %v473_v18  ;;  %v613_v4 = vpop.permute.xlu0 %612 }
 0x133   : > { %1507 = vmatprep.subr.bf16.mxu0 %v1506_v22 }
 0x134   : > { %1509 = vmatpush3.bf16.msra.mxu0 %v1506_v22  ;;  %v568_v28 = vpop.f32.mrb[8].mxu1 }
 0x135   : > { %1511 = vmatprep.subr.bf16.mxu0 %v1510_v12  ;;  %v1334_v29 = vpop.f32.mrb[9].mxu1 }
 0x136   : > { %v618_v6 = vpop.permute.xlu0 %617 }
 0x138   : > { %1513 = vmatpush3.bf16.msra.mxu0 %v1510_v12 }
 0x139   : > { %1515 = vmatprep.subr.bf16.mxu0 %v1514_v24 }
 0x13c   : > { %1517 = vmatpush3.bf16.msra.mxu0 %v1514_v24 }
 0x13d   : > { %1519 = vmatprep.subr.bf16.mxu0 %v1518_v14 }
 0x140   : > { %1521 = vmatpush3.bf16.msra.mxu0 %v1518_v14 }
 0x141   : > { %1523 = vmatprep.subr.bf16.mxu0 %v1522_v26 }
 0x144   : > { %1525 = vmatpush3.bf16.msra.mxu0 %v1522_v26 }
 0x145   : > { %1363 = vmatprep.subr.mxu0 %v568_v28 }
 0x148   : > { %1364 = vmatpush3.msra.mxu0 %v568_v28 }
 0x149   : > { %1366 = vmatmul.mubr.msk.f32.vlgmr.msra.gmra.mrb[10].mxu0 %vm630_vm1, %v588_v35  ;;  %1559 = vmatprep.subr.bf16.mxu0 %v1558_v34 }
 0x14a   : > { %1368 = vmatprep.mubr.msk.f32.mxu0 %vm630_vm1, %v589_v36  ;;  %1561 = vmatpush3.bf16.msra.mxu0 %v1558_v34 }
 0x14b   : > { %1563 = vmatprep.subr.bf16.mxu0 %v1562_v37 }
 0x14d   : > { %1369 = vmatmul.mubr.msk.f32.gmra.mrb[12].mxu0 %vm630_vm1, %v590_v40 }
 0x14e   : > { %1565 = vmatpush3.bf16.msra.mxu0 %v1562_v37 }
 0x14f   : > { %1567 = vmatprep.subr.bf16.mxu0 %v1566_v41 }
 0x152   : > { %1569 = vmatpush3.bf16.msra.mxu0 %v1566_v41 }
 0x153   : > { %1571 = vmatprep.subr.bf16.mxu0 %v1570_v44 }
 0x156   : > { %1573 = vmatpush3.bf16.msra.mxu0 %v1570_v44  ;;  %v995_v44 = vpop.permute.xlu0 %994 }
 0x157   : > { %1575 = vmatprep.subr.bf16.mxu0 %v1574_v47 }
 0x15a   : > { %1577 = vmatpush3.bf16.msra.mxu0 %v1574_v47 }
 0x15b   : > { %1579 = vmatprep.subr.bf16.mxu0 %v1578_v50 }
 0x15e   : > { %1581 = vmatpush3.bf16.msra.mxu0 %v1578_v50 }
 0x15f   : > { %1583 = vmatprep.subr.bf16.mxu0 %v1582_v56 }
 0x162   : > { %1585 = vmatpush3.bf16.msra.mxu0 %v1582_v56 }
 0x163   : > { %1587 = vmatprep.subr.bf16.mxu0 %v1586_v3 }
 0x166   : > { %1589 = vmatpush3.bf16.msra.mxu0 %v1586_v3 }
 0x21c   : > { %v1367_v7 = vpop.f32.mrb[10].mxu0 }
 0x21d   : > { %v715_v8 = vadd.f32 %v1367_v7, %v618_v6  ;;  %v709_v9 = vpop.f32.mrb[11].mxu0 }
 0x21e   : > { %v710_v10 = vadd.f32 %v709_v9, %v613_v4 }
 0x21f   : > { %v733_v12 = vmul.f32 0.2, %v715_v8  ;;  %vm729_vm2 = vcmp.ge.f32.partialorder %v715_v8, 0.0 }
 0x220   : > { %vm728_vm3 = vcmp.ge.f32.partialorder %v710_v10, 0.0  ;;  %v732_v13 = vmul.f32 0.2, %v710_v10  ;;  %v1370_v14 = vpop.f32.mrb[12].mxu0 }
 0x221   : > { %v719_v15 = vpop.f32.mrb[13].mxu0  ;;  %v725_v16 = vadd.f32 %v1370_v14, %v628_v11  ;;  %v737_v19 = vsel %vm729_vm2, %v715_v8, %v733_v12 }
 0x222   : > { %v736_v17 = vsel %vm728_vm3, %v710_v10, %v732_v13  ;;  %v720_v18 = vadd.f32 %v719_v15, %v623_v5 }
 0x223   : > { %v735_v20 = vmul.f32 0.2, %v725_v16  ;;  %853 = vmatmul.mubr.f32.vlgmr.msra.gmra.mrb[10].mxu1 %v736_v17  ;;  %1403 = vmatprep.mubr.f32.mxu0 %v736_v17  ;;  %vm731_vm4 = vcmp.ge.f32.partialorder %v725_v16, 0.0 }
 0x224   : > { %v734_v21 = vmul.f32 0.2, %v720_v18  ;;  %1404 = vmatmul.mubr.f32.vlgmr.msra.gmra.mrb[14].mxu0 %v737_v19  ;;  %858 = vmatprep.mubr.f32.mxu1 %v1681_v1  ;;  %vm730_vm5 = vcmp.ge.f32.partialorder %v720_v18, 0.0 }
 0x225   : > { %v739_v22 = vsel %vm731_vm4, %v725_v16, %v735_v20 }
 0x226   : > { %v738_v23 = vsel %vm730_vm5, %v720_v18, %v734_v21 }
 0x227   : > { %859 = vmatmul.mubr.f32.gmra.mrb[12].mxu1 %v737_v19  ;;  %1406 = vmatprep.mubr.f32.mxu0 %v738_v23 }
 0x228   : > { %1407 = vmatmul.mubr.f32.gmra.mrb[16].mxu0 %v739_v22  ;;  %864 = vmatprep.mubr.f32.mxu1 %v1681_v1 }
 0x22b   : > { %865 = vmatmul.mubr.f32.gmra.mrb[14].mxu1 %v738_v23 }
 0x22c   : > { %870 = vmatprep.mubr.f32.mxu1 %v1681_v1 }
 0x22f   : > { %871 = vmatmul.mubr.f32.gmra.mrb[16].mxu1 %v739_v22 }
 0x230   : > { %1433 = vmatprep.mubr.msk.f32.mxu1 %vm1682_vm0, %v1681_v1 }
 0x2f6   : > { %v854_v24 = vpop.f32.mrb[10].mxu1 }
 0x2f7   : > { %v856_v25 = vpop.f32.mrb[11].mxu1  ;;  %v1405_v26 = vpop.f32.mrb[14].mxu0 }
 0x2f8   : > { %v943_v27 = vpop.f32.mrb[15].mxu0 }
 0x2f9   : > { %v1603_v28 = vpack.c.bf16 %v1405_v26, %v943_v27 }
 0x2fa   : > { %v860_v29 = vpop.f32.mrb[12].mxu1 }
 0x2fb   : > { %v1591_v30 = vpack.c.bf16 %v860_v29, %v854_v24  ;;  %v862_v31 = vpop.f32.mrb[13].mxu1  ;;  %v1408_v32 = vpop.f32.mrb[16].mxu0 }
 0x2fc   : > { %v1597_v33 = vpack.c.bf16 %v862_v31, %v856_v25  ;;  %v953_v34 = vpop.f32.mrb[17].mxu0 }
 0x2fd   : > { %v1606_v35 = vpack.c.bf16 %v1408_v32, %v953_v34  ;;  %1592 = vmatpush3.bf16.msra.mxu1 %v1591_v30 }
 0x2fe   : > { %v866_v36 = vpop.f32.mrb[14].mxu1  ;;  %1593 = vmatprep.subr.bf16.mxu1 %v1680_v0 }
 0x2ff   : > { %v868_v37 = vpop.f32.mrb[15].mxu1 }
 0x302   : > { %v872_v38 = vpop.f32.mrb[16].mxu1 }
 0x303   : > { %v1594_v39 = vpack.c.bf16 %v872_v38, %v866_v36  ;;  %v874_v40 = vpop.f32.mrb[17].mxu1 }
 0x304   : > { %v1600_v41 = vpack.c.bf16 %v874_v40, %v868_v37 }
 0x305   : > { %1595 = vmatpush3.bf16.msra.mxu1 %v1594_v39 }
 0x306   : > { %1596 = vmatprep.subr.bf16.mxu1 %v1680_v0 }
 0x309   : > { %1598 = vmatpush3.bf16.msra.mxu1 %v1597_v33 }
 0x30a   : > { %1599 = vmatprep.subr.bf16.mxu1 %v1680_v0 }
 0x30d   : > { %1601 = vmatpush3.bf16.msra.mxu1 %v1600_v41 }
 0x30e   : > { %1602 = vmatprep.subr.bf16.mxu1 %v1680_v0 }
 0x311   : > { %1604 = vmatpush3.bf16.msra.mxu1 %v1603_v28 }
 0x312   : > { %1605 = vmatprep.subr.bf16.mxu1 %v1680_v0  ;;  %v976_v0 = vld [vmem:[%s2015_s5 + $0x10] sm:$0xff] }
 0x315   : > { %1607 = vmatpush3.bf16.msra.mxu1 %v1606_v35 }
 0x318   : > { %1434 = vmatmul.mubr.msk.f32.vlgmr.msra.gmra.mrb[18].mxu1 %vm1007_vm6, %v974_v42 }
 0x319   : > { %1436 = vmatprep.mubr.msk.f32.mxu1 %vm1682_vm0, %v1681_v1 }
 0x31c   : > { %1437 = vmatmul.mubr.msk.f32.gmra.mrb[20].mxu1 %vm1007_vm6, %v975_v43 }
 0x31d   : > { %1439 = vmatprep.mubr.msk.f32.mxu1 %vm1682_vm0, %v1681_v1  ;;  %v1005_v1 = vpop.permute.xlu0 %1004 }
 0x320   : > { %1440 = vmatmul.mubr.msk.f32.gmra.mrb[22].mxu1 %vm1007_vm6, %v976_v0 }
 0x3eb   : > { %v1083_v45 = vpop.f32.mrb[18].mxu1 }
 0x3ec   : > { %v1084_v46 = vadd.f32 %v1083_v45, %v995_v44  ;;  %v1435_v47 = vpop.f32.mrb[19].mxu1 }
 0x3ee   : > { %1097 = vst [vmem:[%s333_s18] sm:$0xff] %v1084_v46 }
 0x3ef   : > { %v1088_v49 = vpop.f32.mrb[20].mxu1 }
 0x3f0   : > { %v1089_v50 = vadd.f32 %v1088_v49, %v1000_v48  ;;  %v1438_v51 = vpop.f32.mrb[21].mxu1 }
 0x3f2   : > { %1098 = vst [vmem:[%s333_s18 + $0x8] sm:$0xff] %v1089_v50 }
 0x3f3   : > { %v1093_v52 = vpop.f32.mrb[22].mxu1 }
 0x3f4   : > { %v1094_v53 = vadd.f32 %v1093_v52, %v1005_v1  ;;  %v1441_v54 = vpop.f32.mrb[23].mxu1 }
 0x3f6   : > { %1099 = vst [vmem:[%s333_s18 + $0x10] sm:$0xff] %v1094_v53 }
 0x3f7 PF: > { %s18_s24 = sadd.s32 1, %s1675_s24  }
 0x3f8   : > { %p15_p3 = scmp.ge.s32.totalorder %s18_s24, 4  }
 0x3fa   :  { %17 = sbr.rel (!%p15_p3) target bundleno = 1 (0x1), region = 89 }
 0x401   :  { %1121 = vsyncpa [#allocation4], 1 }
 0x402   :  { %1123 = vsyncpa [#allocation4 + $0x1], 1 }

</bundles_post_ra>
